<compile_context>
chip_gen: v7x
topology: tpu7x:2x2x1
jax: 0.10.0
libtpu: 0.0.40
codegen_flags: <defaults>
</compile_context>

<pallas_src>
import math
import functools

import jax
import jax.numpy as jnp
from jax.experimental import pallas as pl
from jax.experimental.pallas import tpu as pltpu


def _make_pe_table(seq_len: int, d_model: int) -> jnp.ndarray:
    """Deterministic sinusoidal positional-encoding buffer, shape (seq_len, d_model)."""
    position = jnp.arange(seq_len, dtype=jnp.float32)[:, None]               # (S, 1)
    div_term = jnp.exp(
        jnp.arange(0, d_model, 2, dtype=jnp.float32) * (-math.log(10000.0) / d_model)
    )                                                                         # (D/2,)
    sin = jnp.sin(position * div_term)                                        # even cols
    cos = jnp.cos(position * div_term)                                        # odd cols
    pe = jnp.stack([sin, cos], axis=-1).reshape(seq_len, d_model)             # interleave
    return pe.astype(jnp.float32)


# ---------------------------------------------------------------------------
# Kernels
# ---------------------------------------------------------------------------

def _pe_add_kernel(x_ref, pe_ref, o_ref):
    # Eval / p==0 path: dropout is identity.  pe (1, cc) broadcasts over rows.
    o_ref[...] = x_ref[...] + pe_ref[...]


def _pe_dropout_kernel(seed_ref, x_ref, pe_ref, o_ref, *, p: float):
    y = x_ref[...] + pe_ref[...]
    # Inverted dropout: keep with prob (1-p), scale kept values by 1/(1-p).
    # Multi-word seeding (base seed + grid coords) decorrelates per-tile streams.
    pltpu.prng_seed(seed_ref[0], pl.program_id(0), pl.program_id(1))
    bits = pltpu.bitcast(pltpu.prng_random_bits(y.shape), jnp.uint32)
    threshold = jnp.uint32(min(int(round(p * float(1 << 32))), (1 << 32) - 1))
    scale = jnp.asarray(1.0 / (1.0 - p), y.dtype)
    o_ref[...] = y * jnp.where(bits >= threshold, scale, jnp.zeros((), y.dtype))


# ---------------------------------------------------------------------------
# Tile / VMEM sizing
# ---------------------------------------------------------------------------

def _round_down(x: int, m: int) -> int:
    return (x // m) * m


def _vmem_target_bytes() -> int:
    """Total VMEM the pipeline's double-buffered tiles may use, per generation."""
    try:
        cap = int(pltpu.get_tpu_info().vmem_capacity_bytes)
    except Exception:
        cap = 64 << 20            # conservative (v7x-sized) if the query is unavailable
    if cap >= (100 << 20):        # v5e / v6e: 128 MiB physical VMEM
        return 64 << 20
    return 40 << 20               # v7x: 64 MiB physical VMEM


def _choose_tiles(B: int, SD: int, itemsize: int, target_bytes: int):
    """Pick a lane-dense (bb, cc) block obeying the (8,128) rule.

    bb is a multiple of 8 (or == B), cc is a multiple of 128 (or == SD).
    The double-buffered working set 2*x + 2*out + 2*pe (pe sublane-padded to
    8 rows) is kept under target_bytes.
    """
    min_rows = B if B <= 8 else 8
    # Max full-width rows: 4*bb*SD*it (x+out, double-buffered) + 16*SD*it (pe, padded+dbuf).
    max_rows_full = (target_bytes - 16 * SD * itemsize) // (4 * SD * itemsize)
    if max_rows_full >= min_rows:
        bb = int(max_rows_full)
        bb = B if bb >= B else max(8, _round_down(bb, 8))
        cc = SD
    else:
        # Full rows too wide: fix an 8..32-row block (never 1) and split the
        # flattened column axis in 128-lane chunks within the budget.
        bb = B if B <= 8 else min(max(8, _round_down(B, 8)), 32)
        max_cols = target_bytes // (itemsize * (4 * bb + 16))
        cc = min(max(1, max_cols // 128) * 128, SD)
    return bb, cc


def _derive_vmem_limit(bb: int, cc: int, itemsize: int) -> int:
    """Scoped-VMEM limit derived from the chosen tiles (plus small headroom)."""
    cc_pad = ((cc + 127) // 128) * 128
    bb_pad = ((bb + 7) // 8) * 8
    x_tile = bb_pad * cc_pad * itemsize
    pe_tile = 8 * cc_pad * itemsize          # (1, cc) pads to 8 sublanes in VMEM
    working = 2 * x_tile + 2 * x_tile + 2 * pe_tile
    return int(working + (8 << 20))          # headroom for sems / compiler scratch


# ---------------------------------------------------------------------------
# Wrapper
# ---------------------------------------------------------------------------

def positional_encoding_forward(
    x: jnp.ndarray,
    pe: jnp.ndarray,
    *,
    dropout_p: float = 0.1,
    training: bool = False,
    seed: int = 0,
    donate_x: bool = False,
) -> jnp.ndarray:
    """x: (B, S, D); pe: (seq_len, D) with seq_len >= S. Returns dropout(x + pe[:S])."""
    B, S, D = x.shape
    SD = S * D

    use_dropout = training and dropout_p > 0.0
    if use_dropout and dropout_p >= 1.0:
        # Dropout with p >= 1 zeroes everything (1/(1-p) is undefined).
        return jnp.zeros_like(x)

    # Lane-dense 2-D view: last dim is S*D (full extent or 128-lane chunks).
    x2 = x.reshape(B, SD)
    pe2 = pe[:S, :].reshape(1, SD).astype(x.dtype)

    itemsize = jnp.dtype(x.dtype).itemsize
    target = _vmem_target_bytes()
    bb, cc = _choose_tiles(B, SD, itemsize, target)
    nb = pl.cdiv(B, bb)
    nc = pl.cdiv(SD, cc)

    compiler_params = pltpu.CompilerParams(
        dimension_semantics=("parallel", "parallel"),
        vmem_limit_bytes=_derive_vmem_limit(bb, cc, itemsize),
    )
    out_shape = jax.ShapeDtypeStruct((B, SD), x.dtype)

    if use_dropout:
        # Training path: scalar-prefetch seed + hardware-PRNG dropout.
        # TODO(synk): training dropout cannot bit-match torch's RNG stream
        # (different PRNG); keep-probability semantics are identical.
        kernel = functools.partial(_pe_dropout_kernel, p=float(dropout_p))
        grid_spec = pltpu.PrefetchScalarGridSpec(
            num_scalar_prefetch=1,
            grid=(nc, nb),  # column axis outer, batch inner -> pe stays VMEM-resident
            in_specs=[
                pl.BlockSpec((bb, cc), lambda j, i, seed_ref: (i, j)),   # x
                pl.BlockSpec((1, cc), lambda j, i, seed_ref: (0, j)),    # pe
            ],
            out_specs=pl.BlockSpec((bb, cc), lambda j, i, seed_ref: (i, j)),
        )
        seed_arr = jnp.array([seed], dtype=jnp.int32)
        out2 = pl.pallas_call(
            kernel,
            out_shape=out_shape,
            grid_spec=grid_spec,
            compiler_params=compiler_params,
            input_output_aliases=({1: 0} if donate_x else {}),  # seed is input 0
        )(seed_arr, x2, pe2)
    else:
        # Eval path: no scalar-prefetch seed, no dropout math.
        grid_spec = pl.GridSpec(
            grid=(nc, nb),
            in_specs=[
                pl.BlockSpec((bb, cc), lambda j, i: (i, j)),   # x
                pl.BlockSpec((1, cc), lambda j, i: (0, j)),    # pe
            ],
            out_specs=pl.BlockSpec((bb, cc), lambda j, i: (i, j)),
        )
        out2 = pl.pallas_call(
            _pe_add_kernel,
            out_shape=out_shape,
            grid_spec=grid_spec,
            compiler_params=compiler_params,
            input_output_aliases=({0: 0} if donate_x else {}),
        )(x2, pe2)

    return out2.reshape(B, S, D)


if __name__ == "__main__":
    # Module config (deterministic, in-script): d_model=32, seq_len=8, dropout=0.1
    d_model, seq_len, dropout_p = 32, 8, 0.1
    batch = 2

    pe = _make_pe_table(seq_len, d_model)

    key = jax.random.PRNGKey(0)
    x = jax.random.normal(key, (batch, seq_len, d_model), dtype=jnp.float32)

    # Eval-mode forward (dropout is identity -> exactly matches PyTorch eval).
    out = positional_encoding_forward(x, pe, dropout_p=dropout_p, training=False)
    out = jax.block_until_ready(out)

    # Reference check against plain JAX.
    ref = x + pe[None, :seq_len, :]
    assert jnp.allclose(out, ref, atol=1e-6, rtol=1e-6), "mismatch vs reference"

    # Training-mode dropout uses the TPU hardware PRNG (pltpu.prng_seed), which has
    # no CPU/interpret lowering, so only exercise it on a real TPU backend.
    if jax.default_backend() == "tpu":
        out_train = positional_encoding_forward(
            x, pe, dropout_p=dropout_p, training=True, seed=42
        )
        out_train = jax.block_until_ready(out_train)
        # Every element must be either dropped (0) or kept-and-rescaled.
        kept = ref / (1.0 - dropout_p)
        ok = jnp.isclose(out_train, 0.0, atol=1e-6) | jnp.isclose(
            out_train, kept, atol=1e-5, rtol=1e-5
        )
        assert bool(jnp.all(ok)), "training dropout produced unexpected values"

    print("KERNEL_OK")
</pallas_src>

<mosaic_0001>
module attributes {stable_mosaic.version = 11 : i64} {
  func.func @_pe_add_kernel(%arg0: i32, %arg1: i32, %arg2: memref<2x256xf32, #tpu.memory_space<vmem>>, %arg3: memref<1x256xf32, #tpu.memory_space<vmem>>, %arg4: memref<2x256xf32, #tpu.memory_space<vmem>>) attributes {dimension_semantics = [#tpu.dimension_semantics<parallel>, #tpu.dimension_semantics<parallel>], iteration_bounds = array<i64: 1, 1>, scalar_prefetch = 0 : i64, scratch_operands = 0 : i64, tpu.core_type = #tpu.core_type<tc>, window_params = [{transform_indices = @transform_0, window_bounds = array<i64: 2, 256>}, {transform_indices = @transform_1, window_bounds = array<i64: 1, 256>}, {transform_indices = @transform_2, window_bounds = array<i64: 2, 256>}]} {
    %c0 = arith.constant 0 : index
    %c0_0 = arith.constant 0 : index
    %0 = vector.load %arg2[%c0, %c0_0] : memref<2x256xf32, #tpu.memory_space<vmem>>, vector<2x256xf32>
    %c0_1 = arith.constant 0 : index
    %c0_2 = arith.constant 0 : index
    %1 = vector.load %arg3[%c0_1, %c0_2] : memref<1x256xf32, #tpu.memory_space<vmem>>, vector<1x256xf32>
    %2 = vector.broadcast %1 : vector<1x256xf32> to vector<2x256xf32>
    %3 = arith.addf %0, %2 : vector<2x256xf32>
    %c0_3 = arith.constant 0 : index
    %c0_4 = arith.constant 0 : index
    %4 = vector.load %arg4[%c0_3, %c0_4] : memref<2x256xf32, #tpu.memory_space<vmem>>, vector<2x256xf32>
    tpu.vector_store %arg4[%c0_3, %c0_4], %3 {strides = array<i32>} : memref<2x256xf32, #tpu.memory_space<vmem>>, vector<2x256xf32>,
    return
  }
  func.func @transform_0(%arg0: i32, %arg1: i32) -> (i32, i32) {
    %c0_i32 = arith.constant 0 : i32
    return %arg1, %arg0 : i32, i32
  }
  func.func @transform_1(%arg0: i32, %arg1: i32) -> (i32, i32) {
    %c0_i32 = arith.constant 0 : i32
    %c0_i32_0 = arith.constant 0 : i32
    return %c0_i32, %arg0 : i32, i32
  }
  func.func @transform_2(%arg0: i32, %arg1: i32) -> (i32, i32) {
    %c0_i32 = arith.constant 0 : i32
    return %arg1, %arg0 : i32, i32
  }
}

</mosaic_0001>

<bundles_post_ra>
// kernel: tpu_custom_call.1
= control target key start
LH: loop header
LB: loop body
LE: loop exit
PB: predicated region body
PF: predicated region fallthrough
CT: control target
= control target key end

     0   :  { %7 = vsyncpa [#allocation3], 0  ;;  %s157_s0 = inlined_call_operand.hbm [shape: f32[2,256], index: 0, kind: input, shape index: {}]   ;;  %s158_s1 = inlined_call_operand.vmem [shape: f32[1,256], index: 1, kind: input, shape index: {}]   ;;  %s159_s2 = inlined_call_operand.hbm [shape: f32[2,256], index: 2, kind: output, shape index: {}]  }
   0x1   :  { %8 = vsyncpa [#allocation4], 0  ;;  %s112_s9 = smov [#allocation2]   ;;  %s64_s13 = scalar_lea.hbm %s157_s0, 64 }
   0x2   :  { %s15_s10 = sshll.u32 %s112_s9, 4  ;;  %p65_p0 = scmp.ne.s32.totalorder %s157_s0, %s64_s13  ;;  %s16_s10 = int_to_ptr.vmem [resolvable:$true] %s15_s10 }
   0x3   :  { %p68_p1 = scmp.lt.u32.totalorder %s64_s13, %s157_s0 }
   0x5   :  { %p70_p2 = pnand %p68_p1, %p65_p0 }
   0x7   :  { %73 = shalt.err (!%p70_p2)
}
   0x8   :  { %s74_s18 = scalar_lea.vmem %s16_s10, 64  ;;  %p79_p4 = scmp.lt.s32.totalorder %s16_s10, %s16_s10 }
   0x9   :  { %p75_p3 = scmp.ne.s32.totalorder %s16_s10, %s74_s18  ;;  %p80_p5 = scmp.lt.s32.totalorder %s74_s18, %s74_s18 }
   0xb   :  { %p81_p6 = por %p80_p5, %p79_p4 }
   0xd   :  { %p82_p7 = pnand %p81_p6, %p75_p3 }
   0xf   :  { %85 = shalt.err (!%p82_p7)
}
  0x10   :  { %18 = dma.hbm_to_vmem [thread:$0]  %s157_s0, 64, %s16_s10, [#allocation3]  }
  0x11   :  { %108 = dma.done.wait [#allocation3], 64  }
  0x12   :  { %109 = vsyncadd [#allocation3], 4294967232  ;;  %v27_v0 = vlaneseq  ;;  %v113_v1 = vmov 1983009808   ;;  %v25_v7 = vld [vmem:[%s158_s1] sm:$0x3] }
  0x13   :  { %v37_v2 = vunpack.c.l.s4 %v113_v1  ;;  %v24_v12 = vld [vmem:[#allocation2] sm:$0xf]  ;;  %s114_s23 = smov [#allocation5]  }
  0x14   :  { %v28_v3 = vshrl.u32 %v27_v0, 7  ;;  %s52_s0 = sshll.u32 %s114_s23, 4  ;;  %s53_s0 = int_to_ptr.vmem [resolvable:$true] %s52_s0 }
  0x15   :  { %v38_v6 = vunpack.c.0.s8 %v37_v2  ;;  %s86_s24 = scalar_lea.vmem %s53_s0, 64  ;;  %p91_p9 = scmp.lt.s32.totalorder %s53_s0, %s53_s0 }
  0x16   :  { %v29_v4 = vsub.s32 0, %v28_v3  ;;  %v33_v5 = vsub.s32 1, %v28_v3  ;;  %p87_p8 = scmp.ne.s32.totalorder %s53_s0, %s86_s24  ;;  %p92_p10 = scmp.lt.s32.totalorder %s86_s24, %s86_s24 }
  0x17   :  { %v41_v10 = vsub.s32 %v38_v6, %v28_v3 }
  0x18   :  { %v30_v8 = vrot.slane %v25_v7, %v29_v4  ;;  %v34_v9 = vrot.slane %v25_v7, %v33_v5  ;;  %p93_p11 = por %p92_p10, %p91_p9 }
  0x1a   :  { %v35_v11 = vcombine.low %v30_v8, %v34_v9  ;;  %p94_p12 = pnand %p93_p11, %p87_p8 }
  0x1c   :  { %v42_v13 = vrot.slane %v35_v11, %v41_v10 }
  0x1e   :  { %v44_v14 = vadd.f32 %v42_v13, %v24_v12 }
  0x20   :  { %45 = vst [vmem:[#allocation5] sm:$0xf] %v44_v14 }
  0x21   :  { %97 = shalt.err (!%p94_p12)
}
  0x22   :  { %s98_s26 = scalar_lea.hbm %s159_s2, 64 }
  0x23   :  { %p99_p13 = scmp.ne.s32.totalorder %s159_s2, %s98_s26  ;;  %p102_p0 = scmp.lt.u32.totalorder %s98_s26, %s159_s2 }
  0x25   :  { %p104_p1 = pnand %p102_p0, %p99_p13 }
  0x27   :  { %107 = shalt.err (!%p104_p1)
}
  0x28   :  { %55 = dma.vmem_to_hbm [thread:$0]  %s53_s0, 64, %s159_s2, [#allocation4]  }
  0x29   :  { %110 = dma.done.wait [#allocation4], 64  }
  0x2a   :  { %111 = vsyncadd [#allocation4], 4294967232 }
  0x2b   :  { %59 = vsyncpa [#allocation3], 1 }
  0x2c   :  { %60 = vsyncpa [#allocation4], 1 }

</bundles_post_ra>
